<compile_context>
chip_gen: v6e
topology: v6e:2x2x1
jax: 0.10.0
libtpu: 0.0.40
codegen_flags: <defaults>
</compile_context>

<pallas_src>
import jax
import jax.numpy as jnp
from jax.experimental import pallas as pl
from jax.experimental.pallas import tpu as pltpu

_LANES = 128
_SUBLANES = 8

# Identity pad box: pred == target == [0, 0, 1, 1]  ->  iou = 1, center dist = 0,
# enclosing diagonal = 2  ->  DIoU = 1  ->  (1 - DIoU) = 0 exactly in f32.
_PAD_PLANES = jnp.array([0.0, 0.0, 1.0, 1.0, 0.0, 0.0, 1.0, 1.0], jnp.float32)


def _round_up(x, m):
    return ((x + m - 1) // m) * m


def _diou_loss_kernel(x_ref, out_ref):
    # x_ref  : (8, tile_rows, 128) f32 — coordinate planes, full-vreg tiles.
    # out_ref: (8, 128) f32 — per-core partial-sum accumulator (resident).
    i = pl.program_id(1)  # batch-tile axis ("arbitrary", reduction)

    b1_x1 = x_ref[0]
    b1_y1 = x_ref[1]
    b1_x2 = x_ref[2]
    b1_y2 = x_ref[3]
    b2_x1 = x_ref[4]
    b2_y1 = x_ref[5]
    b2_x2 = x_ref[6]
    b2_y2 = x_ref[7]

    # intersection (matches torch.clamp(..., min=0) + 1 semantics)
    inter_w = jnp.maximum(jnp.minimum(b1_x2, b2_x2) - jnp.maximum(b1_x1, b2_x1), 0.0) + 1.0
    inter_h = jnp.maximum(jnp.minimum(b1_y2, b2_y2) - jnp.maximum(b1_y1, b2_y1), 0.0) + 1.0
    intersect_area = inter_w * inter_h

    b1_area = (b1_x2 - b1_x1 + 1.0) * (b1_y2 - b1_y1 + 1.0)
    b2_area = (b2_x2 - b2_x1 + 1.0) * (b2_y2 - b2_y1 + 1.0)
    union_area = b1_area + b2_area - intersect_area
    iou = intersect_area / union_area

    # smallest enclosing box diagonal
    c_w = jnp.maximum(b1_x2, b2_x2) - jnp.minimum(b1_x1, b2_x1)
    c_h = jnp.maximum(b1_y2, b2_y2) - jnp.minimum(b1_y1, b2_y1)
    c_distance = c_w * c_w + c_h * c_h

    # center distance: (c2 - c1) where c = (lo + hi)/2
    dcx = (b2_x1 + b2_x2 - b1_x1 - b1_x2) * 0.5
    dcy = (b2_y1 + b2_y2 - b1_y1 - b1_y2) * 0.5
    center_distance = dcx * dcx + dcy * dcy

    diou = iou - center_distance / c_distance          # (tile_rows, 128)
    contrib = 1.0 - diou                               # pad lanes contribute exactly 0

    # reduce to an (8,128) partial with pure VPU adds (no cross-lane work in-kernel)
    tile_rows = contrib.shape[0]
    partial = contrib.reshape(tile_rows // _SUBLANES, _SUBLANES, _LANES).sum(axis=0)

    @pl.when(i == 0)
    def _init():
        out_ref[...] = jnp.zeros_like(out_ref)

    out_ref[...] += partial


def _reference_diou_loss(b1, b2):
    """Pure-JAX reference mirroring the PyTorch module (also the small-B path)."""
    b1 = jnp.asarray(b1, jnp.float32)
    b2 = jnp.asarray(b2, jnp.float32)
    b1_wh = b1[:, 2:4] - b1[:, :2]
    b2_wh = b2[:, 2:4] - b2[:, :2]
    inter_x1 = jnp.maximum(b1[:, 0], b2[:, 0])
    inter_y1 = jnp.maximum(b1[:, 1], b2[:, 1])
    inter_x2 = jnp.minimum(b1[:, 2], b2[:, 2])
    inter_y2 = jnp.minimum(b1[:, 3], b2[:, 3])
    inter = (jnp.clip(inter_x2 - inter_x1, 0) + 1) * (jnp.clip(inter_y2 - inter_y1, 0) + 1)
    a1 = (b1_wh[:, 0] + 1) * (b1_wh[:, 1] + 1)
    a2 = (b2_wh[:, 0] + 1) * (b2_wh[:, 1] + 1)
    iou = inter / (a1 + a2 - inter)
    cx1 = jnp.minimum(b1[:, 0], b2[:, 0])
    cy1 = jnp.minimum(b1[:, 1], b2[:, 1])
    cx2 = jnp.maximum(b1[:, 2], b2[:, 2])
    cy2 = jnp.maximum(b1[:, 3], b2[:, 3])
    ctr1x = (b1[:, 0] + b1[:, 2]) / 2
    ctr1y = (b1[:, 1] + b1[:, 3]) / 2
    ctr2x = (b2[:, 0] + b2[:, 2]) / 2
    ctr2y = (b2[:, 1] + b2[:, 3]) / 2
    cd = (ctr2x - ctr1x) ** 2 + (ctr2y - ctr1y) ** 2
    dd = (cx2 - cx1) ** 2 + (cy2 - cy1) ** 2
    diou = iou - cd / dd
    return jnp.mean(1 - diou)


def diou_loss(pred_boxes, target_boxes, *, use_pallas=None, max_tile_rows=1024):
    """pred_boxes, target_boxes: (B, 4) float arrays [x1, y1, x2, y2]."""
    b1 = jnp.asarray(pred_boxes, jnp.float32)
    b2 = jnp.asarray(target_boxes, jnp.float32)
    batch = b1.shape[0]

    # Tiny batches: Pallas launch/step overhead dominates; XLA's fused
    # elementwise path is as fast or faster.
    if use_pallas is None:
        use_pallas = batch >= 4096
    if not use_pallas:
        return _reference_diou_loss(b1, b2)

    # --- tiling choice (4 MiB input tile by default, double-buffered) ---
    r_min = pl.cdiv(batch, _LANES)
    if r_min <= max_tile_rows:
        tile_rows = _round_up(r_min, _SUBLANES)
        n_tiles = 1
        num_cores = 1
    else:
        tile_rows = _round_up(max_tile_rows, _SUBLANES)
        n_tiles = pl.cdiv(r_min, tile_rows)
        num_cores = 2 if n_tiles >= 2 else 1   # use both TCs on v7x
        n_tiles = _round_up(n_tiles, num_cores)
    tiles_per_core = n_tiles // num_cores
    rows_pad = n_tiles * tile_rows
    batch_pad = rows_pad * _LANES

    # Single coordinate-planar slab: (8, rows_pad, 128), one relayout pass.
    # Padding uses identity boxes so padded lanes contribute exactly 0 loss.
    planar = jnp.concatenate([b1, b2], axis=1).T              # (8, batch)
    if batch_pad > batch:
        pad_block = jnp.broadcast_to(_PAD_PLANES[:, None], (8, batch_pad - batch))
        planar = jnp.concatenate([planar, pad_block], axis=1)
    x = planar.reshape(8, rows_pad, _LANES)

    partials = pl.pallas_call(
        _diou_loss_kernel,
        out_shape=jax.ShapeDtypeStruct((num_cores * _SUBLANES, _LANES), jnp.float32),
        grid=(num_cores, tiles_per_core),
        in_specs=[
            pl.BlockSpec(
                (8, tile_rows, _LANES),
                lambda c, i: (0, c * tiles_per_core + i, 0),
            )
        ],
        out_specs=pl.BlockSpec((_SUBLANES, _LANES), lambda c, i: (c, 0)),
        compiler_params=pltpu.CompilerParams(
            dimension_semantics=("parallel", "arbitrary"),
            vmem_limit_bytes=32 * 1024 * 1024,
        ),
    )(x)

    # Final cross-lane reduce + single 1/B normalization, done once in XLA.
    return jnp.sum(partials) / batch


if __name__ == "__main__":
    key = jax.random.PRNGKey(0)

    def make_boxes(k, n):
        k1, k2 = jax.random.split(k)
        xy1 = jax.random.uniform(k1, (n, 2), jnp.float32, 0.0, 10.0)
        wh = jax.random.uniform(k2, (n, 2), jnp.float32, 1.0, 6.0)
        return jnp.concatenate([xy1, xy1 + wh], axis=1)   # well-formed (n, 4)

    kp, kt, kp2, kt2 = jax.random.split(key, 4)

    # Case 1: tiny batch, forced through the Pallas kernel
    # (single tile, heavy identity-box padding -> exercises exact-zero padding).
    pred_s = make_boxes(kp, 8)
    tgt_s = make_boxes(kt, 8)
    loss_s = jax.block_until_ready(diou_loss(pred_s, tgt_s, use_pallas=True))
    ref_s = jax.block_until_ready(_reference_diou_loss(pred_s, tgt_s))
    assert jnp.allclose(loss_s, ref_s, rtol=1e-5, atol=1e-5), (loss_s, ref_s)

    # Case 2: multi-tile grid with the 2-way core-split axis and a padded tail
    # (small max_tile_rows keeps the test cheap while exercising the
    #  tiled-accumulation / dual-core code path used for large B).
    pred_m = make_boxes(kp2, 3000)
    tgt_m = make_boxes(kt2, 3000)
    loss_m = jax.block_until_ready(
        diou_loss(pred_m, tgt_m, use_pallas=True, max_tile_rows=8)
    )
    ref_m = jax.block_until_ready(_reference_diou_loss(pred_m, tgt_m))
    assert jnp.allclose(loss_m, ref_m, rtol=1e-4, atol=1e-4), (loss_m, ref_m)

    # Case 3: small-batch auto-dispatch falls back to the fused XLA path.
    loss_auto = jax.block_until_ready(diou_loss(pred_s, tgt_s))
    assert jnp.allclose(loss_auto, ref_s, rtol=1e-5, atol=1e-5), (loss_auto, ref_s)

    print("KERNEL_OK")
</pallas_src>

<mosaic_0001>
module attributes {stable_mosaic.version = 11 : i64} {
  func.func @_diou_loss_kernel(%arg0: i32, %arg1: i32, %arg2: memref<8x8x128xf32, #tpu.memory_space<vmem>>, %arg3: memref<8x128xf32, #tpu.memory_space<vmem>>) attributes {dimension_semantics = [#tpu.dimension_semantics<parallel>, #tpu.dimension_semantics<arbitrary>], iteration_bounds = array<i64: 1, 1>, scalar_prefetch = 0 : i64, scratch_operands = 0 : i64, tpu.core_type = #tpu.core_type<tc>, window_params = [{transform_indices = @transform_0, window_bounds = array<i64: 8, 8, 128>}, {transform_indices = @transform_1, window_bounds = array<i64: 8, 128>}]} {
    %c0 = arith.constant 0 : index
    %c0_0 = arith.constant 0 : index
    %c0_1 = arith.constant 0 : index
    %0 = vector.load %arg2[%c0, %c0_0, %c0_1] : memref<8x8x128xf32, #tpu.memory_space<vmem>>, vector<1x8x128xf32>
    %1 = vector.shape_cast %0 : vector<1x8x128xf32> to vector<8x128xf32>
    %c1 = arith.constant 1 : index
    %c0_2 = arith.constant 0 : index
    %c0_3 = arith.constant 0 : index
    %2 = vector.load %arg2[%c1, %c0_2, %c0_3] : memref<8x8x128xf32, #tpu.memory_space<vmem>>, vector<1x8x128xf32>
    %3 = vector.shape_cast %2 : vector<1x8x128xf32> to vector<8x128xf32>
    %c2 = arith.constant 2 : index
    %c0_4 = arith.constant 0 : index
    %c0_5 = arith.constant 0 : index
    %4 = vector.load %arg2[%c2, %c0_4, %c0_5] : memref<8x8x128xf32, #tpu.memory_space<vmem>>, vector<1x8x128xf32>
    %5 = vector.shape_cast %4 : vector<1x8x128xf32> to vector<8x128xf32>
    %c3 = arith.constant 3 : index
    %c0_6 = arith.constant 0 : index
    %c0_7 = arith.constant 0 : index
    %6 = vector.load %arg2[%c3, %c0_6, %c0_7] : memref<8x8x128xf32, #tpu.memory_space<vmem>>, vector<1x8x128xf32>
    %7 = vector.shape_cast %6 : vector<1x8x128xf32> to vector<8x128xf32>
    %c4 = arith.constant 4 : index
    %c0_8 = arith.constant 0 : index
    %c0_9 = arith.constant 0 : index
    %8 = vector.load %arg2[%c4, %c0_8, %c0_9] : memref<8x8x128xf32, #tpu.memory_space<vmem>>, vector<1x8x128xf32>
    %9 = vector.shape_cast %8 : vector<1x8x128xf32> to vector<8x128xf32>
    %c5 = arith.constant 5 : index
    %c0_10 = arith.constant 0 : index
    %c0_11 = arith.constant 0 : index
    %10 = vector.load %arg2[%c5, %c0_10, %c0_11] : memref<8x8x128xf32, #tpu.memory_space<vmem>>, vector<1x8x128xf32>
    %11 = vector.shape_cast %10 : vector<1x8x128xf32> to vector<8x128xf32>
    %c6 = arith.constant 6 : index
    %c0_12 = arith.constant 0 : index
    %c0_13 = arith.constant 0 : index
    %12 = vector.load %arg2[%c6, %c0_12, %c0_13] : memref<8x8x128xf32, #tpu.memory_space<vmem>>, vector<1x8x128xf32>
    %13 = vector.shape_cast %12 : vector<1x8x128xf32> to vector<8x128xf32>
    %c7 = arith.constant 7 : index
    %c0_14 = arith.constant 0 : index
    %c0_15 = arith.constant 0 : index
    %14 = vector.load %arg2[%c7, %c0_14, %c0_15] : memref<8x8x128xf32, #tpu.memory_space<vmem>>, vector<1x8x128xf32>
    %15 = vector.shape_cast %14 : vector<1x8x128xf32> to vector<8x128xf32>
    %16 = arith.minimumf %5, %13 : vector<8x128xf32>
    %17 = arith.maximumf %1, %9 : vector<8x128xf32>
    %18 = arith.subf %16, %17 : vector<8x128xf32>
    %cst = arith.constant 0.000000e+00 : f32
    %19 = vector.broadcast %cst : f32 to vector<8x128xf32>
    %20 = arith.maximumf %18, %19 : vector<8x128xf32>
    %cst_16 = arith.constant 1.000000e+00 : f32
    %21 = vector.broadcast %cst_16 : f32 to vector<8x128xf32>
    %22 = arith.addf %20, %21 : vector<8x128xf32>
    %23 = arith.minimumf %7, %15 : vector<8x128xf32>
    %24 = arith.maximumf %3, %11 : vector<8x128xf32>
    %25 = arith.subf %23, %24 : vector<8x128xf32>
    %cst_17 = arith.constant 0.000000e+00 : f32
    %26 = vector.broadcast %cst_17 : f32 to vector<8x128xf32>
    %27 = arith.maximumf %25, %26 : vector<8x128xf32>
    %cst_18 = arith.constant 1.000000e+00 : f32
    %28 = vector.broadcast %cst_18 : f32 to vector<8x128xf32>
    %29 = arith.addf %27, %28 : vector<8x128xf32>
    %30 = arith.mulf %22, %29 : vector<8x128xf32>
    %31 = arith.subf %5, %1 : vector<8x128xf32>
    %cst_19 = arith.constant 1.000000e+00 : f32
    %32 = vector.broadcast %cst_19 : f32 to vector<8x128xf32>
    %33 = arith.addf %31, %32 : vector<8x128xf32>
    %34 = arith.subf %7, %3 : vector<8x128xf32>
    %cst_20 = arith.constant 1.000000e+00 : f32
    %35 = vector.broadcast %cst_20 : f32 to vector<8x128xf32>
    %36 = arith.addf %34, %35 : vector<8x128xf32>
    %37 = arith.mulf %33, %36 : vector<8x128xf32>
    %38 = arith.subf %13, %9 : vector<8x128xf32>
    %cst_21 = arith.constant 1.000000e+00 : f32
    %39 = vector.broadcast %cst_21 : f32 to vector<8x128xf32>
    %40 = arith.addf %38, %39 : vector<8x128xf32>
    %41 = arith.subf %15, %11 : vector<8x128xf32>
    %cst_22 = arith.constant 1.000000e+00 : f32
    %42 = vector.broadcast %cst_22 : f32 to vector<8x128xf32>
    %43 = arith.addf %41, %42 : vector<8x128xf32>
    %44 = arith.mulf %40, %43 : vector<8x128xf32>
    %45 = arith.addf %37, %44 : vector<8x128xf32>
    %46 = arith.subf %45, %30 : vector<8x128xf32>
    %47 = arith.divf %30, %46 : vector<8x128xf32>
    %48 = arith.maximumf %5, %13 : vector<8x128xf32>
    %49 = arith.minimumf %1, %9 : vector<8x128xf32>
    %50 = arith.subf %48, %49 : vector<8x128xf32>
    %51 = arith.maximumf %7, %15 : vector<8x128xf32>
    %52 = arith.minimumf %3, %11 : vector<8x128xf32>
    %53 = arith.subf %51, %52 : vector<8x128xf32>
    %54 = arith.mulf %50, %50 : vector<8x128xf32>
    %55 = arith.mulf %53, %53 : vector<8x128xf32>
    %56 = arith.addf %54, %55 : vector<8x128xf32>
    %57 = arith.addf %9, %13 : vector<8x128xf32>
    %58 = arith.subf %57, %1 : vector<8x128xf32>
    %59 = arith.subf %58, %5 : vector<8x128xf32>
    %cst_23 = arith.constant 5.000000e-01 : f32
    %60 = vector.broadcast %cst_23 : f32 to vector<8x128xf32>
    %61 = arith.mulf %59, %60 : vector<8x128xf32>
    %62 = arith.addf %11, %15 : vector<8x128xf32>
    %63 = arith.subf %62, %3 : vector<8x128xf32>
    %64 = arith.subf %63, %7 : vector<8x128xf32>
    %cst_24 = arith.constant 5.000000e-01 : f32
    %65 = vector.broadcast %cst_24 : f32 to vector<8x128xf32>
    %66 = arith.mulf %64, %65 : vector<8x128xf32>
    %67 = arith.mulf %61, %61 : vector<8x128xf32>
    %68 = arith.mulf %66, %66 : vector<8x128xf32>
    %69 = arith.addf %67, %68 : vector<8x128xf32>
    %70 = arith.divf %69, %56 : vector<8x128xf32>
    %71 = arith.subf %47, %70 : vector<8x128xf32>
    %cst_25 = arith.constant 1.000000e+00 : f32
    %72 = vector.broadcast %cst_25 : f32 to vector<8x128xf32>
    %73 = arith.subf %72, %71 : vector<8x128xf32>
    %74 = vector.shape_cast %73 : vector<8x128xf32> to vector<1x8x128xf32>
    %cst_26 = arith.constant dense<0.000000e+00> : vector<8x128xf32>
    %75 = vector.multi_reduction <add>, %74, %cst_26 [0] : vector<1x8x128xf32> to vector<8x128xf32>
    %c0_i32 = arith.constant 0 : i32
    %76 = arith.cmpi eq, %arg1, %c0_i32 : i32
    %77 = arith.extui %76 : i1 to i32
    %c0_i32_27 = arith.constant 0 : i32
    %78 = arith.cmpi ne, %77, %c0_i32_27 : i32
    scf.if %78 {
      %cst_32 = arith.constant 0.000000e+00 : f32
      %82 = vector.broadcast %cst_32 : f32 to vector<8x128xf32>
      %c0_33 = arith.constant 0 : index
      %c0_34 = arith.constant 0 : index
      %83 = vector.load %arg3[%c0_33, %c0_34] : memref<8x128xf32, #tpu.memory_space<vmem>>, vector<8x128xf32>
      tpu.vector_store %arg3[%c0_33, %c0_34], %82 {strides = array<i32>} : memref<8x128xf32, #tpu.memory_space<vmem>>, vector<8x128xf32>,
    } else {
    }
    %c0_28 = arith.constant 0 : index
    %c0_29 = arith.constant 0 : index
    %79 = vector.load %arg3[%c0_28, %c0_29] : memref<8x128xf32, #tpu.memory_space<vmem>>, vector<8x128xf32>
    %80 = arith.addf %79, %75 : vector<8x128xf32>
    %c0_30 = arith.constant 0 : index
    %c0_31 = arith.constant 0 : index
    %81 = vector.load %arg3[%c0_30, %c0_31] : memref<8x128xf32, #tpu.memory_space<vmem>>, vector<8x128xf32>
    tpu.vector_store %arg3[%c0_30, %c0_31], %80 {strides = array<i32>} : memref<8x128xf32, #tpu.memory_space<vmem>>, vector<8x128xf32>,
    return
  }
  func.func @transform_0(%arg0: i32, %arg1: i32) -> (i32, i32, i32) {
    %c1_i32 = arith.constant 1 : i32
    %0 = arith.muli %arg0, %c1_i32 : i32
    %1 = arith.addi %0, %arg1 : i32
    %c0_i32 = arith.constant 0 : i32
    %c0_i32_0 = arith.constant 0 : i32
    %c0_i32_1 = arith.constant 0 : i32
    return %c0_i32, %1, %c0_i32_0 : i32, i32, i32
  }
  func.func @transform_1(%arg0: i32, %arg1: i32) -> (i32, i32) {
    %c0_i32 = arith.constant 0 : i32
    %c0_i32_0 = arith.constant 0 : i32
    return %arg0, %c0_i32 : i32, i32
  }
}

</mosaic_0001>

<bundles_post_ra>
// kernel: tpu_custom_call.1
= control target key start
LH: loop header
LB: loop body
LE: loop exit
PB: predicated region body
PF: predicated region fallthrough
CT: control target
= control target key end

     0   :  { %6 = vsyncpa [#allocation3], 0  ;;  %s188_s0 = inlined_call_operand.hbm [shape: f32[8,8,128], index: 0, kind: input, shape index: {}]   ;;  %s189_s1 = inlined_call_operand.hbm [shape: f32[8,128], index: 1, kind: output, shape index: {}]  }
   0x1   :  { %7 = vsyncpa [#allocation4], 0  ;;  %s168_s6 = smov [#allocation2]  }
   0x2   :  { %s16_s7 = sshll.u32 %s168_s6, 4  ;;  %s17_s7 = int_to_ptr.vmem [resolvable:$true] %s16_s7 }
   0x3   :  { %s132_s8 = scalar_lea.vmem %s17_s7, 1024  ;;  %p137_p1 = scmp.lt.s32.totalorder %s17_s7, %s17_s7 }
   0x4   :  { %p133_p0 = scmp.ne.s32.totalorder %s17_s7, %s132_s8  ;;  %p138_p2 = scmp.lt.s32.totalorder %s132_s8, %s132_s8 }
   0x6   :  { %p139_p3 = por %p138_p2, %p137_p1 }
   0x8   :  { %p140_p4 = pnand %p139_p3, %p133_p0 }
   0xa   :  { %143 = shalt.err (!%p140_p4)
}
   0xb   :  { %s169_s9 = smov 128   ;;  %s170_s10 = smov 8  }
   0xc   :  { %22 = dma.hbm_to_vmem [thread:$0]  %s188_s0, 1024, %s17_s7, [#allocation3], %s169_s9, %s169_s9, %s170_s10  }
   0xd   :  { %164 = dma.done.wait [#allocation3], 1024  }
   0xe   :  { %165 = vsyncadd [#allocation3], 4294966272  ;;  %v27_v0 = vld [vmem:[#allocation2] sm:$0xff]  ;;  %v29_v1 = vld [vmem:[#allocation2 + $0x8] sm:$0xff]  ;;  %s171_s0 = smov [#allocation5]  }
   0xf   :  { %v31_v2 = vld [vmem:[#allocation2 + $0x10] sm:$0xff]  ;;  %v33_v3 = vld [vmem:[#allocation2 + $0x18] sm:$0xff]  ;;  %v35_v4 = vld [vmem:[#allocation2 + $0x20] sm:$0xff]  ;;  %s106_s13 = sshll.u32 %s171_s0, 4  ;;  %s107_s13 = int_to_ptr.vmem [resolvable:$true] %s106_s13 }
  0x10   :  { %v37_v5 = vld [vmem:[#allocation2 + $0x28] sm:$0xff]  ;;  %v53_v6 = vsub.f32 %v31_v2, %v27_v0  ;;  %v39_v7 = vld [vmem:[#allocation2 + $0x30] sm:$0xff]  ;;  %v41_v8 = vld [vmem:[#allocation2 + $0x38] sm:$0xff]  ;;  %v43_v9 = vmax.f32 %v27_v0, %v35_v4  ;;  %v55_v11 = vsub.f32 %v33_v3, %v29_v1  ;;  %v68_v12 = vmin.f32 %v27_v0, %v35_v4  ;;  %s144_s14 = scalar_lea.vmem %s107_s13, 128  ;;  %p149_p6 = scmp.lt.s32.totalorder %s107_s13, %s107_s13 }
  0x11   :  { %v48_v10 = vmax.f32 %v29_v1, %v37_v5  ;;  %v42_v13 = vmin.f32 %v31_v2, %v39_v7  ;;  %v47_v14 = vmin.f32 %v33_v3, %v41_v8  ;;  %v58_v16 = vsub.f32 %v39_v7, %v35_v4  ;;  %p145_p5 = scmp.ne.s32.totalorder %s107_s13, %s144_s14  ;;  %p150_p7 = scmp.lt.s32.totalorder %s144_s14, %s144_s14 }
  0x12   :  { %v54_v15 = vadd.f32 1.0, %v53_v6  ;;  %v56_v17 = vadd.f32 1.0, %v55_v11  ;;  %v60_v18 = vsub.f32 %v41_v8, %v37_v5  ;;  %v67_v19 = vmax.f32 %v31_v2, %v39_v7 }
  0x13   :  { %v70_v20 = vmax.f32 %v33_v3, %v41_v8  ;;  %v44_v21 = vsub.f32 %v42_v13, %v43_v9  ;;  %v49_v22 = vsub.f32 %v47_v14, %v48_v10  ;;  %v59_v23 = vadd.f32 1.0, %v58_v16  ;;  %p151_p8 = por %p150_p7, %p149_p6 }
  0x14   :  { %v71_v24 = vmin.f32 %v29_v1, %v37_v5  ;;  %v57_v25 = vmul.f32 %v56_v17, %v54_v15  ;;  %v61_v26 = vadd.f32 1.0, %v60_v18  ;;  %v69_v27 = vsub.f32 %v67_v19, %v68_v12 }
  0x15   :  { %v76_v28 = vadd.f32 %v39_v7, %v35_v4  ;;  %v45_v29 = vmax.f32 %v44_v21, 0.0  ;;  %v50_v30 = vmax.f32 %v49_v22, 0.0  ;;  %v80_v32 = vadd.f32 %v41_v8, %v37_v5  ;;  %p152_p9 = pnand %p151_p8, %p145_p5 }
  0x16   :  { %v72_v31 = vsub.f32 %v70_v20, %v71_v24  ;;  %v62_v33 = vmul.f32 %v61_v26, %v59_v23  ;;  %v73_v34 = vmul.f32 %v69_v27, %v69_v27 }
  0x17   :  { %v77_v35 = vsub.f32 %v76_v28, %v27_v0  ;;  %v46_v36 = vadd.f32 1.0, %v45_v29  ;;  %v51_v37 = vadd.f32 1.0, %v50_v30  ;;  %v81_v39 = vsub.f32 %v80_v32, %v29_v1 }
  0x18   :  { %v74_v38 = vmul.f32 %v72_v31, %v72_v31  ;;  %v63_v40 = vadd.f32 %v62_v33, %v57_v25 }
  0x19   :  { %v52_v41 = vmul.f32 %v51_v37, %v46_v36  ;;  %v78_v43 = vsub.f32 %v77_v35, %v31_v2  ;;  %v82_v44 = vsub.f32 %v81_v39, %v33_v3 }
  0x1a   :  { %v75_v42 = vadd.f32 %v74_v38, %v73_v34 }
  0x1b   :  { %v64_v45 = vsub.f32 %v63_v40, %v52_v41  ;;  %v79_v46 = vmul.f32 0.5, %v78_v43  ;;  %v83_v47 = vmul.f32 0.5, %v82_v44 }
  0x1c   :  { %120 = vrcp.f32 %v75_v42 }
  0x1d   :  { %122 = vrcp.f32 %v64_v45  ;;  %v84_v48 = vmul.f32 %v79_v46, %v79_v46  ;;  %v85_v49 = vmul.f32 %v83_v47, %v83_v47 }
  0x1f   :  { %v86_v50 = vadd.f32 %v85_v49, %v84_v48 }
  0x29   :  { %v121_v51 = vpop.eup %120 }
  0x2a   :  { %v88_v52 = vmul.f32 %v121_v51, %v86_v50  ;;  %v123_v53 = vpop.eup %122 }
  0x2b   :  { %v66_v54 = vmul.f32 %v123_v53, %v52_v41 }
  0x2d   :  { %v89_v55 = vsub.f32 %v66_v54, %v88_v52 }
  0x2f   :  { %v90_v56 = vsub.f32 1.0, %v89_v55 }
  0x31   :  { %99 = vst [vmem:[#allocation5] sm:$0xff] %v90_v56 }
  0x32   :  { %155 = shalt.err (!%p152_p9)
}
  0x33   :  { %109 = dma.vmem_to_hbm [thread:$0]  %s107_s13, 128, %s189_s1, [#allocation4]  }
  0x34   :  { %166 = dma.done.wait [#allocation4], 128  }
  0x35   :  { %167 = vsyncadd [#allocation4], 4294967168 }
  0x36   :  { %113 = vsyncpa [#allocation3], 1 }
  0x37   :  { %114 = vsyncpa [#allocation4], 1 }

</bundles_post_ra>
